<compile_context>
chip_gen: v6e
topology: v6e:2x2x1
jax: 0.10.0
libtpu: 0.0.40
codegen_flags: <defaults>
</compile_context>

<pallas_src>
import jax
import jax.numpy as jnp
from jax.experimental import pallas as pl
from jax.experimental.pallas import tpu as pltpu

NUM_SEG = 12       # fixed by the module (W is (1, 12))
LANES = 128        # dense1 output width
HID2 = 16          # dense output width
NUM_CLASSES = 4
OUT_PAD = 8        # classes padded to one sublane group


def _round_up(n, m):
    return ((n + m - 1) // m) * m


def wsnet_kernel(x_ref, w1_ref, b1_ref, w2_ref, b2_ref, w3_ref, b3_ref, o_ref):
    """One batch tile.

    x_ref  : (tb, S*H)   bf16  -- segment-flattened input rows
    w1_ref : (S*H, 128)  bf16  -- concat_s (W[s]/sum(W)) * dense1.weight.T
    b1_ref : (1, 128)    f32
    w2_ref : (128, 128)  bf16  -- dense.weight.T, zero-padded 16 -> 128 cols
    b2_ref : (1, 128)    f32   -- zero-padded
    w3_ref : (8, 128)    bf16  -- out.weight, padded 4->8 rows / 16->128 cols
    b3_ref : (8, 1)      f32   -- zero-padded
    o_ref  : (8, tb)     f32   -- transposed, lane-dense logits; rows [0,4) real
    """
    # Layer 1: single K=S*H matmul; segment-weighted sum and 1/sum(W) are
    # folded into w1_ref, so  acc == ((W @ x)/sum(W)) @ dense1.weight.T.
    acc = jnp.dot(x_ref[...], w1_ref[...], preferred_element_type=jnp.float32)
    h1 = jnp.maximum(acc + b1_ref[...], 0.0).astype(jnp.bfloat16)        # (tb,128)
    # Layer 2 (padded 16 -> 128; the pad columns are exactly zero).
    h2 = jnp.maximum(
        jnp.dot(h1, w2_ref[...], preferred_element_type=jnp.float32)
        + b2_ref[...], 0.0).astype(jnp.bfloat16)                         # (tb,128)
    # Layer 3, computed transposed so the HBM writeback is compact AND
    # lane-dense:  logits_t[c, b] = sum_k w3[c, k] * h2[b, k].
    logits_t = jax.lax.dot_general(
        w3_ref[...], h2, (((1,), (1,)), ((), ())),
        preferred_element_type=jnp.float32)                              # (8, tb)
    o_ref[...] = logits_t + b3_ref[...]


def wsnet_forward(x, params, *, tb=1024):
    """Pallas forward. x: (12, B, H) f32. Returns (B, 4) f32."""
    W, w1, b1, w2, b2, w3, b3 = params
    S, B, H = x.shape
    SH = S * H

    # Batch tile must be a multiple of 128 (output block is (8, tb) with the
    # batch on the lane axis). Batch is zero-padded up to a multiple of tb.
    tb = max(LANES, min(_round_up(tb, LANES), _round_up(B, LANES)))
    B_pad = _round_up(B, tb)
    grid = (B_pad // tb,)

    # (S, B, H) -> (B, S*H) bf16, zero-padded on batch (cast fused before the
    # re-layout to halve its traffic).
    x_flat = jnp.transpose(x.astype(jnp.bfloat16), (1, 0, 2)).reshape(B, SH)
    if B_pad != B:
        x_flat = jnp.pad(x_flat, ((0, B_pad - B), (0, 0)))

    # Fold 1/sum(W) and the per-segment weights into one (S*H, 128) matrix:
    #   w1cat[s*H + h, j] = (W[s]/sum(W)) * dense1.weight[j, h]
    w_norm = (W / jnp.sum(W)).reshape(S)
    w1cat = (w_norm[:, None, None] * w1.T[None, :, :]).reshape(SH, LANES)
    w1cat = w1cat.astype(jnp.bfloat16)
    b1_r = b1.reshape(1, LANES).astype(jnp.float32)

    # Lane-padded narrow layers (bf16 weights, f32 biases).
    w2_p = jnp.zeros((LANES, LANES), jnp.float32).at[:, :HID2].set(w2.T)
    w2_p = w2_p.astype(jnp.bfloat16)
    b2_p = jnp.zeros((1, LANES), jnp.float32).at[0, :HID2].set(b2)
    w3_p = jnp.zeros((OUT_PAD, LANES), jnp.float32).at[:NUM_CLASSES, :HID2].set(w3)
    w3_p = w3_p.astype(jnp.bfloat16)
    b3_p = jnp.zeros((OUT_PAD, 1), jnp.float32).at[:NUM_CLASSES, 0].set(b3)

    flops = 2 * B_pad * (SH * LANES + LANES * LANES + LANES * OUT_PAD)
    bytes_accessed = (x_flat.size * 2 + OUT_PAD * B_pad * 4
                      + (w1cat.size + w2_p.size + w3_p.size) * 2
                      + (b1_r.size + b2_p.size + b3_p.size) * 4)
    cost = pl.CostEstimate(flops=flops, transcendentals=0,
                           bytes_accessed=bytes_accessed)

    # VMEM budget: double-buffered x/out tiles + resident weights + f32
    # intermediates. Only override the scoped default when we would exceed it
    # (large tb, mainly a v5e concern).
    vmem_est = (2 * (tb * SH * 2 + OUT_PAD * tb * 4)
                + 2 * ((w1cat.size + w2_p.size + w3_p.size) * 2
                       + (b1_r.size + b2_p.size + b3_p.size) * 4)
                + 3 * tb * LANES * 4)
    cp_kwargs = dict(dimension_semantics=("parallel",))
    if vmem_est > 12 * 1024 * 1024:
        cp_kwargs["vmem_limit_bytes"] = min(int(vmem_est * 3 // 2),
                                            64 * 1024 * 1024)

    out_t = pl.pallas_call(
        wsnet_kernel,
        out_shape=jax.ShapeDtypeStruct((OUT_PAD, B_pad), jnp.float32),
        grid=grid,
        in_specs=[
            pl.BlockSpec((tb, SH), lambda i: (i, 0)),          # x batch tile
            pl.BlockSpec((SH, LANES), lambda i: (0, 0)),       # w1cat (resident)
            pl.BlockSpec((1, LANES), lambda i: (0, 0)),        # b1
            pl.BlockSpec((LANES, LANES), lambda i: (0, 0)),    # w2 (padded)
            pl.BlockSpec((1, LANES), lambda i: (0, 0)),        # b2 (padded)
            pl.BlockSpec((OUT_PAD, LANES), lambda i: (0, 0)),  # w3 (padded)
            pl.BlockSpec((OUT_PAD, 1), lambda i: (0, 0)),      # b3 (padded)
        ],
        out_specs=pl.BlockSpec((OUT_PAD, tb), lambda i: (0, i)),
        compiler_params=pltpu.CompilerParams(**cp_kwargs),
        cost_estimate=cost,
    )(x_flat, w1cat, b1_r, w2_p, b2_p, w3_p, b3_p)

    # (8, B_pad) transposed/padded logits -> (B, 4)
    return out_t[:NUM_CLASSES, :B].T


def wsnet_reference(x, params):
    """Plain-JAX f32 reference mirroring the PyTorch forward exactly."""
    W, w1, b1, w2, b2, w3, b3 = params
    xp = jnp.transpose(x, (1, 0, 2))                  # (B, 12, H)
    y = jnp.matmul(W, xp)                             # (B, 1, H)
    y = jnp.squeeze(y, axis=1)                        # (B, H)
    y = y / jnp.sum(W, axis=1)                        # divide by sum(W)
    h1 = jnp.maximum(y @ w1.T + b1, 0.0)
    h2 = jnp.maximum(h1 @ w2.T + b2, 0.0)
    return h2 @ w3.T + b3


def init_params(hdim, key):
    k1, k2, k3, k4, k5, k6 = jax.random.split(key, 6)
    W = jnp.ones((1, NUM_SEG), jnp.float32)                      # torch.ones(1, 12)
    w1 = jax.random.normal(k1, (128, hdim), jnp.float32) * 0.05  # dense1
    b1 = jax.random.normal(k2, (128,), jnp.float32) * 0.05
    w2 = jax.random.normal(k3, (16, 128), jnp.float32) * 0.05    # dense
    b2 = jax.random.normal(k4, (16,), jnp.float32) * 0.05
    w3 = jax.random.normal(k5, (4, 16), jnp.float32) * 0.05      # out
    b3 = jax.random.normal(k6, (4,), jnp.float32) * 0.05
    return (W, w1, b1, w2, b2, w3, b3)


if __name__ == "__main__":
    hdim = 32
    batch = 512                      # small, but gives a 4-step "parallel" grid
    key = jax.random.PRNGKey(0)
    kx, kp = jax.random.split(key)
    x = jax.random.normal(kx, (NUM_SEG, batch, hdim), jnp.float32)
    params = init_params(hdim, kp)

    out = jax.block_until_ready(wsnet_forward(x, params, tb=128))
    ref = jax.block_until_ready(wsnet_reference(x, params))

    assert out.shape == (batch, NUM_CLASSES), out.shape
    # bf16 inputs/weights (f32 accumulation) -> loosened tolerance vs f32 ref.
    err = float(jnp.max(jnp.abs(out - ref)))
    assert jnp.allclose(out, ref, atol=1e-2, rtol=1e-2), ("mismatch", err)
    print("KERNEL_OK")
</pallas_src>

<mosaic_0001>
module attributes {stable_mosaic.version = 11 : i64} {
  func.func @wsnet_kernel(%arg0: i32, %arg1: memref<128x384xbf16, #tpu.memory_space<vmem>>, %arg2: memref<384x128xbf16, #tpu.memory_space<vmem>>, %arg3: memref<1x128xf32, #tpu.memory_space<vmem>>, %arg4: memref<128x128xbf16, #tpu.memory_space<vmem>>, %arg5: memref<1x128xf32, #tpu.memory_space<vmem>>, %arg6: memref<8x128xbf16, #tpu.memory_space<vmem>>, %arg7: memref<8x1xf32, #tpu.memory_space<vmem>>, %arg8: memref<8x128xf32, #tpu.memory_space<vmem>>) attributes {dimension_semantics = [#tpu.dimension_semantics<parallel>], iteration_bounds = array<i64: 4>, scalar_prefetch = 0 : i64, scratch_operands = 0 : i64, tpu.core_type = #tpu.core_type<tc>, window_params = [{transform_indices = @transform_0, window_bounds = array<i64: 128, 384>}, {pipeline_mode = #tpu.pipeline_mode<synchronous>, transform_indices = @transform_1, window_bounds = array<i64: 384, 128>}, {pipeline_mode = #tpu.pipeline_mode<synchronous>, transform_indices = @transform_2, window_bounds = array<i64: 1, 128>}, {pipeline_mode = #tpu.pipeline_mode<synchronous>, transform_indices = @transform_3, window_bounds = array<i64: 128, 128>}, {pipeline_mode = #tpu.pipeline_mode<synchronous>, transform_indices = @transform_4, window_bounds = array<i64: 1, 128>}, {pipeline_mode = #tpu.pipeline_mode<synchronous>, transform_indices = @transform_5, window_bounds = array<i64: 8, 128>}, {pipeline_mode = #tpu.pipeline_mode<synchronous>, transform_indices = @transform_6, window_bounds = array<i64: 8, 1>}, {transform_indices = @transform_7, window_bounds = array<i64: 8, 128>}]} {
    %c0 = arith.constant 0 : index
    %c0_0 = arith.constant 0 : index
    %0 = vector.load %arg1[%c0, %c0_0] : memref<128x384xbf16, #tpu.memory_space<vmem>>, vector<128x384xbf16>
    %c0_1 = arith.constant 0 : index
    %c0_2 = arith.constant 0 : index
    %1 = vector.load %arg2[%c0_1, %c0_2] : memref<384x128xbf16, #tpu.memory_space<vmem>>, vector<384x128xbf16>
    %cst = arith.constant dense<0.000000e+00> : vector<128x128xf32>
    %2 = tpu.matmul %0, %1, %cst {dimension_numbers = #tpu.dot_dimension_numbers<[1], [0], [0], [1], [0, 0, 1, 1], [], []>} : vector<128x384xbf16>, vector<384x128xbf16>, vector<128x128xf32> -> vector<128x128xf32>
    %c0_3 = arith.constant 0 : index
    %c0_4 = arith.constant 0 : index
    %3 = vector.load %arg3[%c0_3, %c0_4] : memref<1x128xf32, #tpu.memory_space<vmem>>, vector<1x128xf32>
    %4 = vector.broadcast %3 : vector<1x128xf32> to vector<128x128xf32>
    %5 = arith.addf %2, %4 : vector<128x128xf32>
    %cst_5 = arith.constant 0.000000e+00 : f32
    %6 = vector.broadcast %cst_5 : f32 to vector<128x128xf32>
    %7 = arith.maximumf %5, %6 : vector<128x128xf32>
    %8 = arith.truncf %7 : vector<128x128xf32> to vector<128x128xbf16>
    %c0_6 = arith.constant 0 : index
    %c0_7 = arith.constant 0 : index
    %9 = vector.load %arg4[%c0_6, %c0_7] : memref<128x128xbf16, #tpu.memory_space<vmem>>, vector<128x128xbf16>
    %cst_8 = arith.constant dense<0.000000e+00> : vector<128x128xf32>
    %10 = tpu.matmul %8, %9, %cst_8 {dimension_numbers = #tpu.dot_dimension_numbers<[1], [0], [0], [1], [0, 0, 1, 1], [], []>} : vector<128x128xbf16>, vector<128x128xbf16>, vector<128x128xf32> -> vector<128x128xf32>
    %c0_9 = arith.constant 0 : index
    %c0_10 = arith.constant 0 : index
    %11 = vector.load %arg5[%c0_9, %c0_10] : memref<1x128xf32, #tpu.memory_space<vmem>>, vector<1x128xf32>
    %12 = vector.broadcast %11 : vector<1x128xf32> to vector<128x128xf32>
    %13 = arith.addf %10, %12 : vector<128x128xf32>
    %cst_11 = arith.constant 0.000000e+00 : f32
    %14 = vector.broadcast %cst_11 : f32 to vector<128x128xf32>
    %15 = arith.maximumf %13, %14 : vector<128x128xf32>
    %16 = arith.truncf %15 : vector<128x128xf32> to vector<128x128xbf16>
    %c0_12 = arith.constant 0 : index
    %c0_13 = arith.constant 0 : index
    %17 = vector.load %arg6[%c0_12, %c0_13] : memref<8x128xbf16, #tpu.memory_space<vmem>>, vector<8x128xbf16>
    %cst_14 = arith.constant dense<0.000000e+00> : vector<8x128xf32>
    %18 = tpu.matmul %17, %16, %cst_14 {dimension_numbers = #tpu.dot_dimension_numbers<[1], [1], [0], [0], [0, 0, 1, 0], [], []>} : vector<8x128xbf16>, vector<128x128xbf16>, vector<8x128xf32> -> vector<8x128xf32>
    %c0_15 = arith.constant 0 : index
    %c0_16 = arith.constant 0 : index
    %19 = vector.load %arg7[%c0_15, %c0_16] : memref<8x1xf32, #tpu.memory_space<vmem>>, vector<8x1xf32>
    %20 = vector.broadcast %19 : vector<8x1xf32> to vector<8x128xf32>
    %21 = arith.addf %18, %20 : vector<8x128xf32>
    %c0_17 = arith.constant 0 : index
    %c0_18 = arith.constant 0 : index
    %22 = vector.load %arg8[%c0_17, %c0_18] : memref<8x128xf32, #tpu.memory_space<vmem>>, vector<8x128xf32>
    tpu.vector_store %arg8[%c0_17, %c0_18], %21 {strides = array<i32>} : memref<8x128xf32, #tpu.memory_space<vmem>>, vector<8x128xf32>,
    return
  }
  func.func @transform_0(%arg0: i32) -> (i32, i32) {
    %c0_i32 = arith.constant 0 : i32
    %c0_i32_0 = arith.constant 0 : i32
    return %arg0, %c0_i32 : i32, i32
  }
  func.func @transform_1(%arg0: i32) -> (i32, i32) {
    %c0_i32 = arith.constant 0 : i32
    %c0_i32_0 = arith.constant 0 : i32
    %c0_i32_1 = arith.constant 0 : i32
    return %c0_i32, %c0_i32_0 : i32, i32
  }
  func.func @transform_2(%arg0: i32) -> (i32, i32) {
    %c0_i32 = arith.constant 0 : i32
    %c0_i32_0 = arith.constant 0 : i32
    %c0_i32_1 = arith.constant 0 : i32
    return %c0_i32, %c0_i32_0 : i32, i32
  }
  func.func @transform_3(%arg0: i32) -> (i32, i32) {
    %c0_i32 = arith.constant 0 : i32
    %c0_i32_0 = arith.constant 0 : i32
    %c0_i32_1 = arith.constant 0 : i32
    return %c0_i32, %c0_i32_0 : i32, i32
  }
  func.func @transform_4(%arg0: i32) -> (i32, i32) {
    %c0_i32 = arith.constant 0 : i32
    %c0_i32_0 = arith.constant 0 : i32
    %c0_i32_1 = arith.constant 0 : i32
    return %c0_i32, %c0_i32_0 : i32, i32
  }
  func.func @transform_5(%arg0: i32) -> (i32, i32) {
    %c0_i32 = arith.constant 0 : i32
    %c0_i32_0 = arith.constant 0 : i32
    %c0_i32_1 = arith.constant 0 : i32
    return %c0_i32, %c0_i32_0 : i32, i32
  }
  func.func @transform_6(%arg0: i32) -> (i32, i32) {
    %c0_i32 = arith.constant 0 : i32
    %c0_i32_0 = arith.constant 0 : i32
    %c0_i32_1 = arith.constant 0 : i32
    return %c0_i32, %c0_i32_0 : i32, i32
  }
  func.func @transform_7(%arg0: i32) -> (i32, i32) {
    %c0_i32 = arith.constant 0 : i32
    %c0_i32_0 = arith.constant 0 : i32
    return %c0_i32, %arg0 : i32, i32
  }
}

</mosaic_0001>

<bundles_post_ra>
// kernel: tpu_custom_call.1
= control target key start
LH: loop header
LB: loop body
LE: loop exit
PB: predicated region body
PF: predicated region fallthrough
CT: control target
= control target key end

     0   :  { %s2105_s0 = inlined_call_operand.hbm [shape: bf16[512,384], index: 0, kind: input, shape index: {}]   ;;  %s2106_s1 = inlined_call_operand.hbm [shape: bf16[384,128], index: 1, kind: input, shape index: {}]   ;;  %s2107_s2 = inlined_call_operand.vmem [shape: f32[1,128], index: 2, kind: input, shape index: {}]   ;;  %s2108_s3 = inlined_call_operand.hbm [shape: bf16[128,128], index: 3, kind: input, shape index: {}]   ;;  %s2109_s4 = inlined_call_operand.vmem [shape: f32[1,128], index: 4, kind: input, shape index: {}]   ;;  %s2110_s5 = inlined_call_operand.vmem [shape: bf16[8,128], index: 5, kind: input, shape index: {}]   ;;  %s2111_s6 = inlined_call_operand.vmem [shape: f32[8,1], index: 6, kind: input, shape index: {}]   ;;  %s2112_s7 = inlined_call_operand.hbm [shape: f32[8,512], index: 7, kind: output, shape index: {}]  }
   0x1   :  { %2117 = sst [smem:[#allocation12_spill]] %s2106_s1 }
   0x2   :  { %12 = vsyncpa [#allocation3], 0 }
   0x3   :  { %14 = vsyncpa [#allocation3 + $0x1], 0 }
   0x4   :  { %15 = vsyncpa [#allocation6], 0 }
   0x5   :  { %16 = vsyncpa [#allocation4], 0 }
   0x6   :  { %18 = vsyncpa [#allocation4 + $0x1], 0  ;;  %s1855_s24 = smov 0   ;;  %s1857_s25 = smov 0  }
   0x7   :  { %s1859_s26 = smov 0   ;;  %s1861_s27 = smov 0  }
   0x8 LB: > { %s1876_s28 = sadd.s32 4294967295, %s1802_s27   ;;  %s1249_s29 = sadd.s32 4294967294, %s1802_s27   ;;  %s1802_s27 = sphi %s1861_s27, %s2135_s27   ;;  %s1798_s26 = sphi %s1859_s26, %s2134_s26   ;;  %s1794_s25 = sphi %s1857_s25, %s2133_s25   ;;  %s1790_s24 = sphi %s1855_s24, %s2132_s24  }
   0x9   : > { %p44_p0 = scmp.ne.s32.totalorder %s1794_s25, %s1790_s24  ;;  %p2113_p1 = scmp.eq.s32.totalorder %s1876_s28, 0 }
   0xa   : > { %p200_p3 = scmp.eq.s32.totalorder %s1249_s29, 3  ;;  %p1250_p5 = scmp.ge.s32.totalorder %s1802_s27, 1 }
   0xb   : > { %p1885_p4 = por %p2113_p1, %p44_p0  ;;  %p207_p7 = scmp.lt.s32.totalorder %s1802_s27, 5 }
   0xc   : > { %p1890_p6 = por %p200_p3, %p44_p0  ;;  %s1804_s10 = smov [#allocation5]  }
   0xd   : > { %s2118_s30 = scalar_select %p1885_p4, 1, 0 }
   0xe   : > { %s2119_s8 = scalar_select %p1890_p6, 1, 0 }
   0xf   : > { %p1895_p8 = pnand %p1250_p5, %p207_p7  ;;  %s219_s11 = sshll.u32 %s1804_s10, 4  ;;  %s220_s11 = int_to_ptr.vmem [resolvable:$true] %s219_s11 }
  0x10   : > { %s1805_s13 = smov [#allocation7]   ;;  %s1665_s15 = scalar_lea.vmem %s220_s11, 3072 }
  0x11   : > { %s2120_s9 = scalar_select %p1895_p8, 1, 0 }
  0x12   : > { %p1527_p9 = pneg %p1895_p8  ;;  %s235_s14 = sshll.u32 %s1805_s13, 4  ;;  %s236_s14 = int_to_ptr.vmem [resolvable:$true] %s235_s14 }
  0x13   : > { %p1666_p12 = scmp.ne.s32.totalorder %s220_s11, %s1665_s15  ;;  %p1673_p3 = scmp.lt.s32.totalorder %s220_s11, %s220_s11 }
  0x14   : > { %p1903_p10 = pnand %p1527_p9, %p2113_p1  ;;  %p1674_p5 = scmp.lt.s32.totalorder %s1665_s15, %s1665_s15 }
  0x16   : > { %p1656_p11 = pneg %p1903_p10  ;;  %p1675_p7 = por %p1674_p5, %p1673_p3 }
  0x18   : > { %p1668_p13 = pnand %p1666_p12, %p1656_p11 }
  0x1a   : > { %p1669_p0 = pneg %p1668_p13 }
  0x1c   : > { %p1676_p9 = pnand %p1675_p7, %p1669_p0 }
  0x1e   : > { %1679 = shalt.err (!%p1676_p9)
}
  0x1f   : > { %s1806_s16 = smov 64   ;;  %s1807_s17 = smov 4  }
  0x20   : > { %s2122_s1 = sld [smem:[#allocation12_spill]]  ;;  %s1691_s20 = scalar_lea.vmem %s236_s14, 1024 }
  0x21   : > { %p1692_p1 = scmp.ne.s32.totalorder %s236_s14, %s1691_s20  ;;  %p1699_p2 = scmp.lt.s32.totalorder %s236_s14, %s236_s14 }
  0x22   : > { %p1700_p6 = scmp.lt.s32.totalorder %s1691_s20, %s1691_s20 }
  0x23   : > { %p1694_p12 = pnand %p1692_p1, %p1656_p11 }
  0x24   : > { %p1701_p3 = por %p1700_p6, %p1699_p2 }
  0x25   : > { %p1695_p13 = pneg %p1694_p12 }
  0x26   : > { %1530 = dma.hbm_to_vmem [thread:$0]  (!%p1903_p10), %s2122_s1, 3072, %s220_s11, [#allocation6], %s1806_s16, %s1806_s16, %s1807_s17  }
  0x27   : > { %p1702_p0 = pnand %p1701_p3, %p1695_p13 }
  0x29   : > { %1705 = shalt.err (!%p1702_p0)
}
  0x2a   : > { %1533 = dma.hbm_to_vmem [thread:$0]  (!%p1903_p10), %s2108_s3, 1024, %s236_s14, [#allocation6], %s1806_s16, %s1806_s16, %s1807_s17  }
  0x2b   : > { %s1926_s23 = sadd.s32 1, %s1802_s27   ;;  %s31_s29 = sadd.s32 1, %s1798_s26 }
  0x2c   : > { %s28_s10 = ssub.s32 %s1802_s27, %s1926_s23  ;;  %p38_p1 = scmp.ne.s32.totalorder %s1798_s26, %s1794_s25 }
  0x2d   : > { %p29_p2 = scmp.eq.s32.totalorder %s28_s10, 0  ;;  %p39_p6 = scmp.eq.s32.totalorder %s1802_s27, 0 }
  0x2e   : > { %p2123_p11 = scmp.eq.s32.totalorder %s1876_s28, 3  ;;  %p1544_p7 = scmp.lt.s32.totalorder %s1802_s27, 4 }
  0x2f   : > { %s1942_s12 = scalar_select %p29_p2, %s1798_s26, %s31_s29  }
  0x30   : > { %p1936_p5 = por %p2123_p11, %p38_p1  ;;  %p40_p9 = por %p39_p6, %p38_p1 }
  0x31   : > { %s258_s13 = sand.u32 1, %s1798_s26   ;;  %s1513_s14 = smul.u32 3072, %s1802_s27 }
  0x32   : > { %s2124_s11 = scalar_select %p1936_p5, 1, 0 }
  0x33   : > { %s1512_s15 = smul.u32 192, %s258_s13  ;;  %p1946_p10 = pnand %p1544_p7, %p40_p9 }
  0x34   : > { %s1953_s19 = scalar_lea.hbm %s2105_s0, %s1513_s14  ;;  %s1957_s22 = scalar_lea.sflag [#allocation3], %s258_s13 }
  0x35   : > { %s262_s20 = scalar_lea.vmem [#allocation2], %s1512_s15  ;;  %s1706_s29 = scalar_lea.hbm %s1953_s19, 3072 }
  0x36   : > { %s270_s21 = sshll.u32 %s262_s20, 4  ;;  %p1707_p12 = scmp.ne.s32.totalorder %s1953_s19, %s1706_s29  ;;  %s1955_s21 = int_to_ptr.vmem [resolvable:$true] %s270_s21 }
  0x37   : > { %p1708_p13 = pneg %p1946_p10  ;;  %s1711_s14 = scalar_lea.hbm %s2105_s0, 12288 }
  0x38   : > { %p1712_p1 = scmp.lt.s32.totalorder %s1953_s19, %s2105_s0  ;;  %p1713_p2 = scmp.lt.s32.totalorder %s1711_s14, %s1706_s29 }
  0x39   : > { %p1709_p3 = pnand %p1708_p13, %p1707_p12 }
  0x3a   : > { %p1714_p6 = por %p1713_p2, %p1712_p1 }
  0x3b   : > { %p1710_p0 = pneg %p1709_p3 }
  0x3d   : > { %p1715_p11 = pnand %p1714_p6, %p1710_p0 }
  0x3f   : > { %1718 = shalt.err (!%p1715_p11)
}
  0x40   : > { %s1719_s13 = scalar_lea.vmem %s1955_s21, 3072  ;;  %s1808_s15 = smov [#allocation2]  }
  0x41   : > { %p1720_p7 = scmp.ne.s32.totalorder %s1955_s21, %s1719_s13  ;;  %s1724_s20 = sshll.u32 %s1808_s15, 4  ;;  %s1725_s20 = int_to_ptr.vmem [resolvable:$false] %s1724_s20 }
  0x42   : > { %s1726_s10 = scalar_lea.vmem %s1725_s20, 6144  ;;  %p1727_p3 = scmp.lt.s32.totalorder %s1955_s21, %s1725_s20 }
  0x43   : > { %p1722_p9 = pnand %p1720_p7, %p1708_p13  ;;  %p1728_p5 = scmp.lt.s32.totalorder %s1726_s10, %s1719_s13 }
  0x45   : > { %p1723_p12 = pneg %p1722_p9  ;;  %p1729_p4 = por %p1728_p5, %p1727_p3 }
  0x47   : > { %p1730_p8 = pnand %p1729_p4, %p1723_p12 }
  0x49   : > { %1733 = shalt.err (!%p1730_p8)
}
  0x4a   : > { %s1809_s1 = smov 192   ;;  %s1810_s29 = smov 12  }
  0x4b   : > { %1537 = dma.hbm_to_vmem [thread:$0]  (!%p1946_p10), %s1953_s19, 3072, %s1955_s21, %s1957_s22, %s1809_s1, %s1809_s1, %s1810_s29  }
  0x4c   : > { %p2126_p13 = scmp.ne.s32.totalorder %s2120_s9, 0 }
  0x4d   : > { %s1981_s17 = sand.u32 (!%p2126_p13), 1, %s1794_s25   ;;  %p2127_p4 = scmp.ne.s32.totalorder (!%p2126_p13), %s2118_s30, 0 }
  0x4e   : > { %282 = sbr.rel (%p2126_p13) target bundleno = 860 (0x35c), region = 48  ;;  %s285_s18 = scalar_lea.sflag (!%p2126_p13), [#allocation3], %s1981_s17 }
  0x4f   : > { %s1514_s14 = smul.u32 (!%p2126_p13), 192, %s1981_s17 }
  0x51   : > { %s1985_s13 = scalar_lea.vmem (!%p2126_p13), [#allocation2], %s1514_s14 }
  0x53   : > { %1777 = dma.done.wait (%p2127_p4), %s285_s18, 3072  }
  0x54   : > { %1779 = vsyncadd (%p2127_p4), %s285_s18, 4294964224  ;;  %p2128_p8 = scmp.eq.s32.totalorder %s1876_s28, 0 }
  0x56   : > { %1781 = dma.done.wait (%p2128_p8), [#allocation6], 4096   ;;  %p2129_p5 = pmov %p2128_p8 }
  0x57   : > { %v1590_v0 = vld [vmem:[#allocation5 + $0x78] sm:$0xff]   ;;  %v1592_v2 = vld [vmem:[#allocation5 + $0x70] sm:$0xff]   ;;  %v1595_v5 = vld [vmem:[#allocation5 + $0x68] sm:$0xff]   ;;  %vm1812_vm0 = vmmov 0   ;;  %s1260_s10 = sshll.u32 %s1981_s17, 3  ;;  %s1320_s1 = sshll.u32 %s1876_s28, 7 }
  0x58   : > { %1783 = vsyncadd (%p2129_p5), [#allocation6], 4294963200  ;;  %v1591_v1 = vld [vmem:[#allocation5 + $0x38] sm:$0xff]   ;;  %1323 = vmatprep.subr.bf16.mxu0 %v1590_v0  ;;  %v1594_v4 = vld [vmem:[#allocation5 + $0x30] sm:$0xff]   ;;  %s326_s29 = scalar_lea.vmem [#allocation8], %s1260_s10  ;;  %s2063_s30 = scalar_lea.hbm %s2112_s7, %s1320_s1 }
  0x59   : > { %1324 = vmatpush3.bf16.msra.mxu0 %v1591_v1  ;;  %v1593_v3 = vld [vmem:[#allocation5 + $0xb8] sm:$0xff]   ;;  %v1596_v6 = vld [vmem:[#allocation5 + $0xb0] sm:$0xff]   ;;  %v1597_v7 = vld [vmem:[#allocation5 + $0x28] sm:$0xff]   ;;  %s1160_s14 = sshll.u32 %s326_s29, 4  ;;  %s1147_s9 = scalar_lea.sflag [#allocation4], %s1981_s17  ;;  %s2065_s14 = int_to_ptr.vmem [resolvable:$true] %s1160_s14 }
  0x5a   : > { %1325 = vmatprep.subr.bf16.mxu0 %v1592_v2  ;;  %1428 = vmatprep.subr.bf16.mxu1 %v1593_v3  ;;  %v1598_v8 = vld [vmem:[#allocation5 + $0x60] sm:$0xff]   ;;  %v1599_v9 = vld [vmem:[#allocation5 + $0xa8] sm:$0xff]   ;;  %v1601_v11 = vld [vmem:[#allocation5 + $0x58] sm:$0xff]   ;;  %s1734_s16 = scalar_lea.vmem %s2065_s14, 128  ;;  %p2130_p0 = scmp.ne.s32.totalorder %s2124_s11, 0 }
  0x5b   : > { %1429 = vmatpush3.bf16.msra.mxu1 %v1593_v3  ;;  %v1600_v10 = vld [vmem:[#allocation5 + $0x20] sm:$0xff]   ;;  %v1603_v13 = vld [vmem:[#allocation5 + $0x18] sm:$0xff]   ;;  %v1604_v15 = vld [vmem:[#allocation5 + $0x50] sm:$0xff]   ;;  %p1735_p10 = scmp.ne.s32.totalorder %s2065_s14, %s1734_s16  ;;  %s1814_s28 = smov [#allocation8]  }
  0x5c   : > { %1430 = vmatprep.subr.bf16.mxu1 %v1596_v6  ;;  %v1602_v12 = vld [vmem:[#allocation5 + $0xa0] sm:$0xff]   ;;  %v1605_v14 = vld [vmem:[#allocation5 + $0x98] sm:$0xff]   ;;  %v1606_v16 = vld [vmem:[#allocation5 + $0x10] sm:$0xff]   ;;  %s1738_s19 = sshll.u32 %s1814_s28, 4  ;;  %s1739_s19 = int_to_ptr.vmem [resolvable:$false] %s1738_s19 }
  0x5d   : > { %1326 = vmatpush3.bf16.msra.mxu0 %v1594_v4  ;;  %v1608_v17 = vld [vmem:[#allocation5 + $0x90] sm:$0xff]   ;;  %v1607_v18 = vld [vmem:[#allocation5 + $0x48] sm:$0xff]   ;;  %v1610_v20 = vld [vmem:[#allocation5 + $0x40] sm:$0xff]   ;;  %p1736_p1 = pnand %p1735_p10, %p2130_p0  ;;  %s1740_s21 = scalar_lea.vmem %s1739_s19, 256 }
  0x5e   : > { %1327 = vmatprep.subr.bf16.mxu0 %v1595_v5  ;;  %v1609_v19 = vld [vmem:[#allocation5 + $0x8] sm:$0xff]   ;;  %v1615_v22 = vld [vmem:[%s1985_s13 + $0x4] ss:$12 sps:$4 sm:$0xff]   ;;  %v1622_v31 = vld [vmem:[%s1985_s13 + $0x34] ss:$12 sps:$4 sm:$0xff]   ;;  %p1741_p6 = scmp.lt.s32.totalorder %s2065_s14, %s1739_s19  ;;  %p1742_p11 = scmp.lt.s32.totalorder %s1740_s21, %s1734_s16 }
  0x5f   : > { %1431 = vmatpush3.bf16.msra.mxu1 %v1596_v6  ;;  %v1611_v21 = vld [vmem:[#allocation5 + $0x88] sm:$0xff]   ;;  %v1612_v23 = vld [vmem:[#allocation5] sm:$0xff]   ;;  %720 = vmatprep.mubr.bf16.mxu0 %v1615_v22  ;;  %v1626_v32 = vld [vmem:[%s1985_s13 + $0x50] ss:$12 sps:$4 sm:$0xff]   ;;  %p1737_p2 = pneg %p1736_p1 }
  0x60   : > { %1432 = vmatprep.subr.bf16.mxu1 %v1599_v9  ;;  %v1617_v24 = vld [vmem:[%s1985_s13 + $0x8] ss:$12 sps:$4 sm:$0xff]   ;;  %v1616_v25 = vld [vmem:[#allocation5 + $0x80] sm:$0xff]   ;;  %v1646_v34 = vld [vmem:[#allocation7 + $0x38] sm:$0xff]   ;;  %p1743_p7 = por %p1742_p11, %p1741_p6 }
  0x61   : > { %1328 = vmatpush3.bf16.msra.mxu0 %v1597_v7  ;;  %1444 = vmatprep.mubr.bf16.mxu1 %v1617_v24  ;;  %v1613_v26 = vld [vmem:[%s1985_s13] ss:$12 sps:$4 sm:$0xff]   ;;  %v1619_v27 = vld [vmem:[%s1985_s13 + $0x1c] ss:$12 sps:$4 sm:$0xff]   ;;  %v1625_v29 = vld [vmem:[%s1985_s13 + $0x38] ss:$12 sps:$4 sm:$0xff]  }
  0x62   : > { %1329 = vmatprep.subr.bf16.mxu0 %v1598_v8  ;;  %v1618_v28 = vld [vmem:[%s1985_s13 + $0x20] ss:$12 sps:$4 sm:$0xff]   ;;  %v1621_v30 = vld [vmem:[%s1985_s13 + $0x18] ss:$12 sps:$4 sm:$0xff]   ;;  %v1633_v33 = vld [vmem:[%s1985_s13 + $0x68] ss:$12 sps:$4 sm:$0xff]   ;;  %p1744_p9 = pnand %p1743_p7, %p1737_p2 }
  0x63   : > { %1433 = vmatpush3.bf16.msra.mxu1 %v1599_v9  ;;  %v1624_v35 = vld [vmem:[%s1985_s13 + $0x30] ss:$12 sps:$4 sm:$0xff]   ;;  %v1627_v37 = vld [vmem:[%s1985_s13 + $0x4c] ss:$12 sps:$4 sm:$0xff]   ;;  %v1629_v40 = vld [vmem:[%s1985_s13 + $0x48] ss:$12 sps:$4 sm:$0xff]  }
  0x64   : > { %1434 = vmatprep.subr.bf16.mxu1 %v1602_v12  ;;  %v1647_v36 = vld [vmem:[#allocation7 + $0x30] sm:$0xff]   ;;  %v1634_v38 = vld [vmem:[%s1985_s13 + $0x80] ss:$12 sps:$4 sm:$0xff]   ;;  %v1641_v39 = vld [vmem:[%s1985_s13 + $0x98] ss:$12 sps:$4 sm:$0xff]  }
  0x65   : > { %1330 = vmatpush3.bf16.msra.mxu0 %v1600_v10  ;;  %v1630_v41 = vld [vmem:[%s1985_s13 + $0x64] ss:$12 sps:$4 sm:$0xff]   ;;  %v1632_v43 = vld [vmem:[%s1985_s13 + $0x60] ss:$12 sps:$4 sm:$0xff]   ;;  %v1635_v44 = vld [vmem:[%s1985_s13 + $0x7c] ss:$12 sps:$4 sm:$0xff]  }
  0x66   : > { %1331 = vmatprep.subr.bf16.mxu0 %v1601_v11  ;;  %v1642_v42 = vld [vmem:[%s1985_s13 + $0xb0] ss:$12 sps:$4 sm:$0xff]   ;;  %v1637_v45 = vld [vmem:[%s1985_s13 + $0x78] ss:$12 sps:$4 sm:$0xff]   ;;  %v1638_v46 = vld [vmem:[%s1985_s13 + $0x94] ss:$12 sps:$4 sm:$0xff]  }
  0x67   : > { %1435 = vmatpush3.bf16.msra.mxu1 %v1602_v12  ;;  %v1640_v47 = vld [vmem:[%s1985_s13 + $0x90] ss:$12 sps:$4 sm:$0xff]   ;;  %v1643_v48 = vld [vmem:[%s1985_s13 + $0xac] ss:$12 sps:$4 sm:$0xff]   ;;  %v1645_v49 = vld [vmem:[%s1985_s13 + $0xa8] ss:$12 sps:$4 sm:$0xff]  }
  0x68   : > { %1436 = vmatprep.subr.bf16.mxu1 %v1605_v14  ;;  %v1648_v50 = vld [vmem:[#allocation7 + $0x28] sm:$0xff]   ;;  %v1649_v51 = vld [vmem:[#allocation7 + $0x20] sm:$0xff]   ;;  %v1650_v52 = vld [vmem:[#allocation7 + $0x18] sm:$0xff]  }
  0x69   : > { %1332 = vmatpush3.bf16.msra.mxu0 %v1603_v13  ;;  %v1651_v53 = vld [vmem:[#allocation7 + $0x10] sm:$0xff]   ;;  %v1652_v54 = vld [vmem:[#allocation7 + $0x8] sm:$0xff]   ;;  %v1653_v55 = vld [vmem:[#allocation7] sm:$0xff]  }
  0x6a   : > { %1333 = vmatprep.subr.bf16.mxu0 %v1604_v15  ;;  %v2022_v58 = vld [vmem:[%s2107_s2] ss:$0 sm:$0xff] }
  0x6b   : > { %1437 = vmatpush3.bf16.msra.mxu1 %v1605_v14 }
  0x6c   : > { %1438 = vmatprep.subr.bf16.mxu1 %v1608_v17 }
  0x6d   : > { %1334 = vmatpush3.bf16.msra.mxu0 %v1606_v16 }
  0x6e   : > { %1335 = vmatprep.subr.bf16.mxu0 %v1607_v18 }
  0x6f   : > { %1439 = vmatpush3.bf16.msra.mxu1 %v1608_v17 }
  0x70   : > { %1440 = vmatprep.subr.bf16.mxu1 %v1611_v21 }
  0x71   : > { %1336 = vmatpush3.bf16.msra.mxu0 %v1609_v19 }
  0x72   : > { %1337 = vmatprep.subr.bf16.mxu0 %v1610_v20 }
  0x73   : > { %1441 = vmatpush3.bf16.msra.mxu1 %v1611_v21 }
  0x74   : > { %1442 = vmatprep.subr.bf16.mxu1 %v1616_v25 }
  0x75   : > { %1338 = vmatpush3.bf16.msra.mxu0 %v1612_v23 }
  0x77   : > { %1443 = vmatpush3.bf16.msra.mxu1 %v1616_v25 }
  0x78   : > { %721 = vmatmul.mubr.bf16.vlgmr.msra.gmra.mxu0 %v1613_v26  ;;  %1460 = vmatprep.subr.bf16.mxu1 %v1646_v34 }
  0x79   : > { %728 = vmatprep.mubr.bf16.mxu0 %v1619_v27 }
  0x7a   : > { %1445 = vmatmul.mubr.bf16.vlgmr.msra.gmra.mxu1 %v1618_v28 }
  0x7b   : > { %1448 = vmatprep.mubr.bf16.mxu1 %v1625_v29  ;;  %1461 = vmatpush3.bf16.msra.mxu1 %v1646_v34 }
  0x7c   : > { %1462 = vmatprep.subr.bf16.mxu1 %v1647_v36 }
  0x7f   : > { %1463 = vmatpush3.bf16.msra.mxu1 %v1647_v36 }
  0x80   : > { %729 = vmatmul.mubr.bf16.gmra.mxu0 %v1621_v30  ;;  %1464 = vmatprep.subr.bf16.mxu1 %v1648_v50 }
  0x81   : > { %736 = vmatprep.mubr.bf16.mxu0 %v1622_v31 }
  0x82   : > { %1449 = vmatmul.mubr.bf16.gmra.mxu1 %v1626_v32 }
  0x83   : > { %1452 = vmatprep.mubr.bf16.mxu1 %v1633_v33  ;;  %1465 = vmatpush3.bf16.msra.mxu1 %v1648_v50 }
  0x84   : > { %1466 = vmatprep.subr.bf16.mxu1 %v1649_v51 }
  0x87   : > { %1467 = vmatpush3.bf16.msra.mxu1 %v1649_v51 }
  0x88   : > { %737 = vmatmul.mubr.bf16.gmra.mxu0 %v1624_v35  ;;  %1468 = vmatprep.subr.bf16.mxu1 %v1650_v52 }
  0x89   : > { %744 = vmatprep.mubr.bf16.mxu0 %v1627_v37 }
  0x8a   : > { %1453 = vmatmul.mubr.bf16.gmra.mxu1 %v1634_v38 }
  0x8b   : > { %1456 = vmatprep.mubr.bf16.mxu1 %v1641_v39  ;;  %1469 = vmatpush3.bf16.msra.mxu1 %v1650_v52 }
  0x8c   : > { %1470 = vmatprep.subr.bf16.mxu1 %v1651_v53 }
  0x8f   : > { %1471 = vmatpush3.bf16.msra.mxu1 %v1651_v53 }
  0x90   : > { %745 = vmatmul.mubr.bf16.gmra.mxu0 %v1629_v40  ;;  %1472 = vmatprep.subr.bf16.mxu1 %v1652_v54 }
  0x91   : > { %752 = vmatprep.mubr.bf16.mxu0 %v1630_v41 }
  0x92   : > { %1457 = vmatmul.mubr.bf16.gmra.mxu1 %v1642_v42 }
  0x93   : > { %1473 = vmatpush3.bf16.msra.mxu1 %v1652_v54 }
  0x94   : > { %1474 = vmatprep.subr.bf16.mxu1 %v1653_v55 }
  0x97   : > { %1475 = vmatpush3.bf16.msra.mxu1 %v1653_v55 }
  0x98   : > { %753 = vmatmul.mubr.bf16.gmra.mxu0 %v1632_v43 }
  0x99   : > { %760 = vmatprep.mubr.bf16.mxu0 %v1635_v44 }
  0xa0   : > { %761 = vmatmul.mubr.bf16.gmra.mxu0 %v1637_v45 }
  0xa1   : > { %768 = vmatprep.mubr.bf16.mxu0 %v1638_v46 }
  0xa8   : > { %769 = vmatmul.mubr.bf16.gmra.mxu0 %v1640_v47 }
  0xa9   : > { %776 = vmatprep.mubr.bf16.mxu0 %v1643_v48 }
  0xb0   : > { %777 = vmatmul.mubr.bf16.gmra.mxu0 %v1645_v49 }
 0x138   : > { %v1339_v56 = vpop.f32.mrf.mxu0 }
 0x13a   : > { %v1340_v57 = vpop.f32.mrf.mxu0  ;;  %v1446_v60 = vpop.f32.mrf.mxu1 }
 0x13b   : > { %v1341_v59 = vadd.f32 %v1340_v57, %v1339_v56 }
 0x13c   : > { %v1342_v61 = vpop.f32.mrf.mxu0  ;;  %v819_v63 = vpop.f32.mrf.mxu1 }
 0x13d   : > { %v723_v62 = vadd.f32 %v1341_v59, %v2022_v58 }
 0x13e   : > { %v1343_v0 = vpop.f32.mrf.mxu0  ;;  %v1447_v2 = vpop.f32.mrf.mxu1 }
 0x13f   : > { %v1344_v1 = vadd.f32 %v1343_v0, %v1342_v61  ;;  %v820_v4 = vadd.f32 %v819_v63, %v723_v62 }
 0x140   : > { %v1345_v3 = vpop.f32.mrf.mxu0  ;;  %v822_v6 = vpop.f32.mrf.mxu1 }
 0x141   : > { %v726_v5 = vadd.f32 %v1344_v1, %v2022_v58  ;;  %v882_v12 = vmax.f32 %v820_v4, 0.0 }
 0x142   : > { %v1346_v7 = vpop.f32.mrf.mxu0  ;;  %v1450_v11 = vpop.f32.mrf.mxu1 }
 0x143   : > { %v1347_v8 = vadd.f32 %v1346_v7, %v1345_v3  ;;  %v823_v9 = vadd.f32 %v822_v6, %v726_v5 }
 0x144   : > { %v1348_v10 = vpop.f32.mrf.mxu0  ;;  %v835_v19 = vpop.f32.mrf.mxu1 }
 0x145   : > { %v731_v13 = vadd.f32 %v1347_v8, %v2022_v58  ;;  %v883_v14 = vmax.f32 %v823_v9, 0.0 }
 0x146   : > { %v1349_v15 = vpop.f32.mrf.mxu0  ;;  %v1451_v26 = vpop.f32.mrf.mxu1 }
 0x147   : > { %v898_v16 = vpack.c.bf16 %v883_v14, %v882_v12  ;;  %v1350_v17 = vadd.f32 %v1349_v15, %v1348_v10  ;;  %v828_v20 = vadd.f32 %v1446_v60, %v731_v13 }
 0x148   : > { %v1351_v18 = vpop.f32.mrf.mxu0  ;;  %v838_v34 = vpop.f32.mrf.mxu1 }
 0x149   : > { %v734_v21 = vadd.f32 %v1350_v17, %v2022_v58  ;;  %1476 = vmatprep.mubr.bf16.mxu1 %v898_v16  ;;  %v884_v27 = vmax.f32 %v828_v20, 0.0 }
 0x14a   : > { %v1352_v22 = vpop.f32.mrf.mxu0  ;;  %v1454_v41 = vpop.f32.mrf.mxu1 }
 0x14b   : > { %v831_v23 = vadd.f32 %v1447_v2, %v734_v21  ;;  %v1353_v24 = vadd.f32 %v1352_v22, %v1351_v18 }
 0x14c   : > { %v1354_v25 = vpop.f32.mrf.mxu0  ;;  %v851_v49 = vpop.f32.mrf.mxu1 }
 0x14d   : > { %v885_v28 = vmax.f32 %v831_v23, 0.0  ;;  %v739_v29 = vadd.f32 %v1353_v24, %v2022_v58 }
 0x14e   : > { %v1355_v30 = vpop.f32.mrf.mxu0  ;;  %v1455_v56 = vpop.f32.mrf.mxu1 }
 0x14f   : > { %v899_v31 = vpack.c.bf16 %v885_v28, %v884_v27  ;;  %v1356_v32 = vadd.f32 %v1355_v30, %v1354_v25  ;;  %v836_v35 = vadd.f32 %v835_v19, %v739_v29 }
 0x150   : > { %v1357_v33 = vpop.f32.mrf.mxu0  ;;  %v854_v1 = vpop.f32.mrf.mxu1 }
 0x151   : > { %1477 = vmatmul.mubr.bf16.vlgmr.msra.gmra.mxu1 %v899_v31  ;;  %v742_v36 = vadd.f32 %v1356_v32, %v2022_v58  ;;  %v886_v42 = vmax.f32 %v836_v35, 0.0 }
 0x152   : > { %v1358_v37 = vpop.f32.mrf.mxu0  ;;  %v1458_v8 = vpop.f32.mrf.mxu1 }
 0x153   : > { %v1359_v38 = vadd.f32 %v1358_v37, %v1357_v33  ;;  %v839_v39 = vadd.f32 %v838_v34, %v742_v36 }
 0x154   : > { %v1360_v40 = vpop.f32.mrf.mxu0  ;;  %v867_v16 = vpop.f32.mrf.mxu1 }
 0x155   : > { %v747_v43 = vadd.f32 %v1359_v38, %v2022_v58  ;;  %v887_v44 = vmax.f32 %v839_v39, 0.0 }
 0x156   : > { %v1361_v45 = vpop.f32.mrf.mxu0  ;;  %v1459_v23 = vpop.f32.mrf.mxu1 }
 0x157   : > { %v900_v46 = vpack.c.bf16 %v887_v44, %v886_v42  ;;  %v1362_v47 = vadd.f32 %v1361_v45, %v1360_v40  ;;  %v844_v50 = vadd.f32 %v1450_v11, %v747_v43 }
 0x158   : > { %v1363_v48 = vpop.f32.mrf.mxu0  ;;  %v870_v31 = vpop.f32.mrf.mxu1 }
 0x159   : > { %v750_v51 = vadd.f32 %v1362_v47, %v2022_v58  ;;  %1480 = vmatprep.mubr.bf16.mxu1 %v900_v46  ;;  %v888_v57 = vmax.f32 %v844_v50, 0.0  ;;  %v1811_v50 = vmov 0.0  }
 0x15a   : > { %v1364_v52 = vpop.f32.mrf.mxu0  ;;  %1492 = vmatprep.subr.bf16.mxu0 %v1811_v50  ;;  %1508 = vmatprep.mubr.msk.bf16.mxu0 %vm1812_vm0, %v1811_v50 }
 0x15b   : > { %v847_v53 = vadd.f32 %v1451_v26, %v750_v51  ;;  %v1365_v54 = vadd.f32 %v1364_v52, %v1363_v48  ;;  %v1099_v51 = vld [vmem:[%s2111_s6] sm:$0xff]  ;;  %v1813_v52 = vmov 0  }
 0x15c   : > { %v1366_v55 = vpop.f32.mrf.mxu0  ;;  %1589 = vset.pattern.permute.xlu0 %v1813_v52 }
 0x15d   : > { %v889_v59 = vmax.f32 %v847_v53, 0.0  ;;  %v755_v60 = vadd.f32 %v1365_v54, %v2022_v58  ;;  %1102 = vperm.xlu0 %1589, %v1099_v51   ;;  %v1310_v53 = vld [vmem:[%s2109_s4] ss:$0 sm:$0xff] }
 0x15e   : > { %v1367_v61 = vpop.f32.mrf.mxu0 }
 0x15f   : > { %v1368_v62 = vadd.f32 %v1367_v61, %v1366_v55  ;;  %v901_v63 = vpack.c.bf16 %v889_v59, %v888_v57  ;;  %v852_v2 = vadd.f32 %v851_v49, %v755_v60 }
 0x160   : > { %v1369_v0 = vpop.f32.mrf.mxu0 }
 0x161   : > { %1481 = vmatmul.mubr.bf16.gmra.mxu1 %v901_v63  ;;  %v758_v3 = vadd.f32 %v1368_v62, %v2022_v58  ;;  %v890_v9 = vmax.f32 %v852_v2, 0.0 }
 0x162   : > { %v1370_v4 = vpop.f32.mrf.mxu0 }
 0x163   : > { %v1371_v5 = vadd.f32 %v1370_v4, %v1369_v0  ;;  %v855_v6 = vadd.f32 %v854_v1, %v758_v3 }
 0x164   : > { %v1372_v7 = vpop.f32.mrf.mxu0 }
 0x165   : > { %v763_v10 = vadd.f32 %v1371_v5, %v2022_v58  ;;  %v891_v11 = vmax.f32 %v855_v6, 0.0 }
 0x166   : > { %v1373_v12 = vpop.f32.mrf.mxu0 }
 0x167   : > { %v902_v13 = vpack.c.bf16 %v891_v11, %v890_v9  ;;  %v1374_v14 = vadd.f32 %v1373_v12, %v1372_v7  ;;  %v860_v17 = vadd.f32 %v1454_v41, %v763_v10 }
 0x168   : > { %v1375_v15 = vpop.f32.mrf.mxu0 }
 0x169   : > { %v766_v18 = vadd.f32 %v1374_v14, %v2022_v58  ;;  %1484 = vmatprep.mubr.bf16.mxu1 %v902_v13  ;;  %v892_v24 = vmax.f32 %v860_v17, 0.0 }
 0x16a   : > { %v1376_v19 = vpop.f32.mrf.mxu0 }
 0x16b   : > { %v863_v20 = vadd.f32 %v1455_v56, %v766_v18  ;;  %v1377_v21 = vadd.f32 %v1376_v19, %v1375_v15 }
 0x16c   : > { %v1378_v22 = vpop.f32.mrf.mxu0 }
 0x16d   : > { %v893_v25 = vmax.f32 %v863_v20, 0.0  ;;  %v771_v26 = vadd.f32 %v1377_v21, %v2022_v58 }
 0x16e   : > { %v1379_v27 = vpop.f32.mrf.mxu0 }
 0x16f   : > { %v1380_v28 = vadd.f32 %v1379_v27, %v1378_v22  ;;  %v903_v29 = vpack.c.bf16 %v893_v25, %v892_v24  ;;  %v868_v32 = vadd.f32 %v867_v16, %v771_v26 }
 0x170   : > { %v1381_v30 = vpop.f32.mrf.mxu0 }
 0x171   : > { %1485 = vmatmul.mubr.bf16.gmra.mxu1 %v903_v29  ;;  %v774_v33 = vadd.f32 %v1380_v28, %v2022_v58  ;;  %v894_v38 = vmax.f32 %v868_v32, 0.0 }
 0x172   : > { %v1382_v34 = vpop.f32.mrf.mxu0 }
 0x173   : > { %v1383_v35 = vadd.f32 %v1382_v34, %v1381_v30  ;;  %v871_v36 = vadd.f32 %v870_v31, %v774_v33 }
 0x174   : > { %v1384_v37 = vpop.f32.mrf.mxu0 }
 0x175   : > { %v779_v39 = vadd.f32 %v1383_v35, %v2022_v58  ;;  %v895_v40 = vmax.f32 %v871_v36, 0.0 }
 0x176   : > { %v1385_v41 = vpop.f32.mrf.mxu0 }
 0x177   : > { %v904_v42 = vpack.c.bf16 %v895_v40, %v894_v38  ;;  %v1386_v43 = vadd.f32 %v1385_v41, %v1384_v37  ;;  %v876_v44 = vadd.f32 %v1458_v8, %v779_v39 }
 0x179   : > { %v782_v45 = vadd.f32 %v1386_v43, %v2022_v58  ;;  %1488 = vmatprep.mubr.bf16.mxu1 %v904_v42  ;;  %v896_v47 = vmax.f32 %v876_v44, 0.0 }
 0x17b   : > { %v879_v46 = vadd.f32 %v1459_v23, %v782_v45 }
 0x17d   : > { %v897_v48 = vmax.f32 %v879_v46, 0.0  ;;  %v1098_v46 = vld [vmem:[%s2110_s5] sm:$0xf] }
 0x17f   : > { %v905_v49 = vpack.c.bf16 %v897_v48, %v896_v47 }
 0x181   : > { %1489 = vmatmul.mubr.bf16.gmra.mxu1 %v905_v49 }
 0x1d8   : > { %v1103_v47 = vpop.permute.xlu0 %1102 }
 0x211   : > { %v1478_v58 = vpop.f32.mrf.mxu1 }
 0x212   : > { %v1020_v55 = vadd.f32 %v1478_v58, %v1310_v53 }
 0x213   : > { %v1011_v54 = vpop.f32.mrf.mxu1 }
 0x214   : > { %v1012_v57 = vadd.f32 %v1310_v53, %v1011_v54  ;;  %v1076_v61 = vmax.f32 %v1020_v55, 0.0 }
 0x215   : > { %v1479_v56 = vpop.f32.mrf.mxu1 }
 0x216   : > { %v1023_v59 = vadd.f32 %v1479_v56, %v1310_v53  ;;  %v1074_v0 = vmax.f32 %v1012_v57, 0.0 }
 0x217   : > { %v1014_v60 = vpop.f32.mrf.mxu1 }
 0x218   : > { %v1077_v62 = vmax.f32 %v1023_v59, 0.0  ;;  %v1015_v63 = vadd.f32 %v1310_v53, %v1014_v60 }
 0x21a   : > { %v1091_v1 = vpack.c.bf16 %v1077_v62, %v1076_v61  ;;  %v1075_v2 = vmax.f32 %v1015_v63, 0.0 }
 0x21c   : > { %v1090_v3 = vpack.c.bf16 %v1075_v2, %v1074_v0 }
 0x221   : > { %v1482_v4 = vpop.f32.mrf.mxu1 }
 0x222   : > { %v1036_v37 = vadd.f32 %v1482_v4, %v1310_v53 }
 0x223   : > { %v1027_v5 = vpop.f32.mrf.mxu1 }
 0x224   : > { %v1080_v39 = vmax.f32 %v1036_v37, 0.0  ;;  %v1028_v42 = vadd.f32 %v1310_v53, %v1027_v5 }
 0x225   : > { %v1483_v6 = vpop.f32.mrf.mxu1 }
 0x226   : > { %v1039_v35 = vadd.f32 %v1483_v6, %v1310_v53  ;;  %v1078_v44 = vmax.f32 %v1028_v42, 0.0 }
 0x227   : > { %v1030_v7 = vpop.f32.mrf.mxu1 }
 0x228   : > { %v1081_v38 = vmax.f32 %v1039_v35, 0.0  ;;  %v1031_v41 = vadd.f32 %v1310_v53, %v1030_v7 }
 0x22a   : > { %v1093_v40 = vpack.c.bf16 %v1081_v38, %v1080_v39  ;;  %v1079_v43 = vmax.f32 %v1031_v41, 0.0 }
 0x22c   : > { %v1092_v45 = vpack.c.bf16 %v1079_v43, %v1078_v44 }
 0x231   : > { %v1486_v8 = vpop.f32.mrf.mxu1 }
 0x232   : > { %v1052_v27 = vadd.f32 %v1486_v8, %v1310_v53 }
 0x233   : > { %v1043_v9 = vpop.f32.mrf.mxu1 }
 0x234   : > { %v1084_v29 = vmax.f32 %v1052_v27, 0.0  ;;  %v1044_v32 = vadd.f32 %v1310_v53, %v1043_v9 }
 0x235   : > { %v1487_v10 = vpop.f32.mrf.mxu1 }
 0x236   : > { %v1055_v25 = vadd.f32 %v1487_v10, %v1310_v53  ;;  %v1082_v34 = vmax.f32 %v1044_v32, 0.0 }
 0x237   : > { %v1046_v11 = vpop.f32.mrf.mxu1 }
 0x238   : > { %v1085_v28 = vmax.f32 %v1055_v25, 0.0  ;;  %v1047_v31 = vadd.f32 %v1310_v53, %v1046_v11 }
 0x23a   : > { %v1095_v30 = vpack.c.bf16 %v1085_v28, %v1084_v29  ;;  %v1083_v33 = vmax.f32 %v1047_v31, 0.0 }
 0x23c   : > { %v1094_v36 = vpack.c.bf16 %v1083_v33, %v1082_v34 }
 0x241   : > { %v1490_v12 = vpop.f32.mrf.mxu1 }
 0x242   : > { %v1068_v14 = vadd.f32 %v1490_v12, %v1310_v53 }
 0x243   : > { %v1059_v13 = vpop.f32.mrf.mxu1 }
 0x244   : > { %v1088_v18 = vmax.f32 %v1068_v14, 0.0  ;;  %v1060_v22 = vadd.f32 %v1310_v53, %v1059_v13 }
 0x245   : > { %v1491_v15 = vpop.f32.mrf.mxu1 }
 0x246   : > { %v1071_v16 = vadd.f32 %v1491_v15, %v1310_v53  ;;  %v1086_v24 = vmax.f32 %v1060_v22, 0.0 }
 0x247   : > { %v1062_v17 = vpop.f32.mrf.mxu1 }
 0x248   : > { %v1089_v19 = vmax.f32 %v1071_v16, 0.0  ;;  %v1063_v21 = vadd.f32 %v1310_v53, %v1062_v17 }
 0x24a   : > { %v1097_v20 = vpack.c.bf16 %v1089_v19, %v1088_v18  ;;  %v1087_v23 = vmax.f32 %v1063_v21, 0.0 }
 0x24c   : > { %1493 = vmatpush3.bf16.xpose.msra.mxu0 %v1097_v20  ;;  %v1096_v26 = vpack.c.bf16 %v1087_v23, %v1086_v24 }
 0x24d   : > { %1494 = vmatprep.subr.bf16.mxu0 %v1811_v50 }
 0x254   : > { %1495 = vmatpush3.bf16.xpose.msra.mxu0 %v1096_v26 }
 0x255   : > { %1496 = vmatprep.subr.bf16.mxu0 %v1811_v50 }
 0x25c   : > { %1497 = vmatpush3.bf16.xpose.msra.mxu0 %v1095_v30 }
 0x25d   : > { %1498 = vmatprep.subr.bf16.mxu0 %v1811_v50 }
 0x264   : > { %1499 = vmatpush3.bf16.xpose.msra.mxu0 %v1094_v36 }
 0x265   : > { %1500 = vmatprep.subr.bf16.mxu0 %v1811_v50 }
 0x26c   : > { %1501 = vmatpush3.bf16.xpose.msra.mxu0 %v1093_v40 }
 0x26d   : > { %1502 = vmatprep.subr.bf16.mxu0 %v1811_v50 }
 0x274   : > { %1503 = vmatpush3.bf16.xpose.msra.mxu0 %v1092_v45 }
 0x275   : > { %1504 = vmatprep.subr.bf16.mxu0 %v1811_v50 }
 0x27c   : > { %1505 = vmatpush3.bf16.xpose.msra.mxu0 %v1091_v1 }
 0x27d   : > { %1506 = vmatprep.subr.bf16.mxu0 %v1811_v50 }
 0x284   : > { %1507 = vmatpush3.bf16.xpose.msra.mxu0 %v1090_v3 }
 0x28b   : > { %1509 = vmatmul.mubr.bf16.vlgmr.msra.gmra.mxu0 %v1098_v46 }
 0x34b   : > { %v1139_v48 = vpop.f32.mrf.mxu0 }
 0x34c   : > { %v1140_v49 = vadd.f32 %v1139_v48, %v1103_v47 }
 0x34d   : > { %v1510_v50 = vpop.f32.mrf.mxu0 }
 0x34e   : > { %1145 = vst [vmem:[%s326_s29] sm:$0xff] %v1140_v49 }
 0x34f   : > { %v1142_v51 = vpop.f32.mrf.mxu0 }
 0x350   : > { %1747 = shalt.err (!%p1744_p9)
}
 0x351   : > { %s1748_s22 = scalar_lea.hbm %s2063_s30, 128  ;;  %s1752_s20 = scalar_lea.hbm %s2112_s7, 512 }
 0x352   : > { %p1749_p12 = scmp.ne.s32.totalorder %s2063_s30, %s1748_s22  ;;  %p1753_p4 = scmp.lt.s32.totalorder %s2063_s30, %s2112_s7 }
 0x353   : > { %p1754_p8 = scmp.lt.s32.totalorder %s1752_s20, %s1748_s22 }
 0x354   : > { %p1750_p3 = pnand %p1749_p12, %p2130_p0 }
 0x355   : > { %p1755_p5 = por %p1754_p8, %p1753_p4 }
 0x356   : > { %p1751_p13 = pneg %p1750_p3 }
 0x358   : > { %p1756_p10 = pnand %p1755_p5, %p1751_p13 }
 0x35a   : > { %1759 = shalt.err (!%p1756_p10)
}
 0x35b   : > { %1525 = dma.vmem_to_hbm [thread:$0]  (%p2130_p0), %s2065_s14, 128, %s2063_s30, %s1147_s9   ;;  %v1511_v52 = vpop.f32.mrf.mxu0 }
 0x35c PF: > { %p1547_p1 = scmp.ge.s32.totalorder %s1802_s27, 2  ;;  %s1172_s29 = sand.u32 1, %s1790_s24  }
 0x35d   : > { %p2131_p2 = scmp.ne.s32.totalorder %s2119_s8, 0  ;;  %s1173_s18 = scalar_lea.sflag [#allocation4], %s1172_s29 }
 0x35f   : > { %p1539_p6 = pnand %p1547_p1, %p2131_p2 }
 0x361   : > { %p1540_p11 = pneg %p1539_p6 }
 0x363   : > { %1785 = dma.done.wait (%p1540_p11), %s1173_s18, 128  }
 0x364   : > { %1787 = vsyncadd (%p1540_p11), %s1173_s18, 4294967168  ;;  %p21_p7 = scmp.ge.s32.totalorder %s1926_s23, 6   ;;  %s2132_s24 = smov %s1794_s25 }
 0x365   : > { %s2133_s25 = smov %s1798_s26  ;;  %s2134_s26 = smov %s1942_s12 }
 0x366   : > { %s2135_s27 = smov %s1926_s23  ;;  %23 = sbr.rel (!%p21_p7) target bundleno = 8 (0x8), region = 101 }
 0x36b   :  { %1178 = vsyncpa [#allocation3], 1 }
 0x36c   :  { %1180 = vsyncpa [#allocation3 + $0x1], 1 }
 0x36d   :  { %1181 = vsyncpa [#allocation6], 1 }
 0x36e   :  { %1182 = vsyncpa [#allocation4], 1 }
 0x36f   :  { %1184 = vsyncpa [#allocation4 + $0x1], 1 }

</bundles_post_ra>
